<compile_context>
chip_gen: v7x
topology: tpu7x:2x2x1
jax: 0.10.0
libtpu: 0.0.40
codegen_flags: <defaults>
</compile_context>

<pallas_src>
import jax
import jax.numpy as jnp
from jax import lax
from jax.experimental import pallas as pl
from jax.experimental.pallas import tpu as pltpu

_MIB = 1024 * 1024


# --------------------------------------------------------------------------- #
# Kernel body factory
# --------------------------------------------------------------------------- #
def _make_kernel(*, n_kt, TK, L2, emit_attn, guard_key_edge):
    """Build the attention kernel body.

    n_kt == 1 : single key block per query tile -> plain masked softmax,
                writes out (and attn if requested).
    n_kt  > 1 : online (flash-style) softmax across key blocks with running
                max / sum scratch; out only (attn not emitted on this path).
    """
    if n_kt > 1:
        assert not emit_attn  # enforced by the tile chooser

    def kernel(q_ref, k_ref, v_ref, keep_ref, *refs):
        if n_kt == 1:
            if emit_attn:
                out_ref, attn_ref = refs
            else:
                (out_ref,) = refs
        else:
            out_ref, acc_ref, m_ref, l_ref = refs

        q = q_ref[...]                               # (TQ, D)
        k = k_ref[...]                               # (TK, D)
        v = v_ref[...]                               # (TK, D)
        keep = keep_ref[...].astype(jnp.float32)     # (1, TK) of {0,1}

        if guard_key_edge:
            # Last key block may read past L2 (padding is unspecified, possibly
            # non-finite): neutralize padded keys in a NaN-safe way.
            kk_e = pl.program_id(2)
            lane_row = lax.broadcasted_iota(jnp.int32, (1, TK), 1)
            lane_col = lax.broadcasted_iota(jnp.int32, (TK, 1), 0)
            valid_row = (kk_e * TK + lane_row) < L2
            valid_col = (kk_e * TK + lane_col) < L2
            keep = jnp.where(valid_row, keep, jnp.float32(0.0))
            k = jnp.where(valid_col, k, jnp.zeros_like(k))
            v = jnp.where(valid_col, v, jnp.zeros_like(v))

        # scores = q @ k^T (no materialized transpose; operands stay in the
        # input dtype for the bf16 MXU fast path, f32 accumulation).
        s = lax.dot_general(
            q, k,
            dimension_numbers=(((1,), (1,)), ((), ())),
            preferred_element_type=jnp.float32)      # (TQ, TK) f32
        # Additive mask bias from the precomputed 0/1 keep tensor.
        s = s + (keep - jnp.float32(1.0)) * jnp.float32(1e30)

        if n_kt == 1:
            # ---- plain masked softmax over the full key axis ---- #
            row_max = jnp.max(s, axis=-1, keepdims=True)
            p = jnp.exp(s - row_max) * keep          # zero fully-masked rows
            denom = jnp.sum(p, axis=-1, keepdims=True)
            inv = pl.reciprocal(denom + jnp.float32(1e-13), approx=False)
            attn = p * inv
            out = lax.dot_general(
                attn.astype(v.dtype), v,
                dimension_numbers=(((1,), (0,)), ((), ())),
                preferred_element_type=jnp.float32)
            out_ref[...] = out.astype(out_ref.dtype)
            if emit_attn:
                attn_ref[...] = attn.astype(attn_ref.dtype)
        else:
            # ---- online softmax across key blocks (out only) ---- #
            kk = pl.program_id(2)

            @pl.when(kk == 0)
            def _():
                acc_ref[...] = jnp.zeros_like(acc_ref)
                l_ref[...] = jnp.zeros_like(l_ref)
                m_ref[...] = jnp.full_like(m_ref, -jnp.inf)

            m_prev = m_ref[...]
            m_new = jnp.maximum(m_prev, jnp.max(s, axis=-1, keepdims=True))
            alpha = jnp.exp(m_prev - m_new)          # (TQ, 1)
            p = jnp.exp(s - m_new) * keep            # (TQ, TK) f32
            l_ref[...] = l_ref[...] * alpha + jnp.sum(p, axis=-1, keepdims=True)
            acc_ref[...] = acc_ref[...] * alpha + lax.dot_general(
                p.astype(v.dtype), v,
                dimension_numbers=(((1,), (0,)), ((), ())),
                preferred_element_type=jnp.float32)
            m_ref[...] = m_new

            @pl.when(kk == n_kt - 1)
            def _():
                inv = pl.reciprocal(l_ref[...] + jnp.float32(1e-13), approx=False)
                out_ref[...] = (acc_ref[...] * inv).astype(out_ref.dtype)

    return kernel


# --------------------------------------------------------------------------- #
# Tiling / VMEM heuristics
# --------------------------------------------------------------------------- #
def _vmem_capacity_bytes():
    try:
        return int(pltpu.get_tpu_info().vmem_capacity_bytes)
    except Exception:
        return 64 * _MIB  # conservative (v7x-sized) fallback


def _step_bytes(TQ, TK, L2, D, in_it, out_it, attn_it, emit_attn, n_kt):
    """Per-grid-step VMEM estimate: double-buffered blocks + f32 temporaries."""
    b = 0
    b += 2 * TQ * D * in_it                 # q blocks (double buffered)
    b += 2 * 2 * TK * D * in_it             # k + v blocks (double buffered)
    b += 2 * 8 * max(TK, 128) * 4           # keep blocks (padded to (8,128) f32)
    b += 2 * TQ * D * out_it                # out blocks
    if emit_attn:
        b += 2 * TQ * L2 * attn_it          # attn blocks
    b += 3 * TQ * TK * 4                    # f32 scores / exp / attn temporaries
    if n_kt > 1:
        b += 4 * TQ * (D + 2)               # acc / m / l f32 scratch
    return b


def _align_query_tile(t, L1):
    t = max(1, int(t))
    if t >= L1:
        return L1
    if t >= 256:
        return (t // 256) * 256
    if t >= 128:
        return 128
    if t >= 8:
        return (t // 8) * 8
    return min(8, L1)


def _pick_tiles(L1, L2, D, in_it, out_it, attn_it, emit_attn, budget,
                query_tile, key_tile):
    # ---- key tile ---- #
    if emit_attn:
        # The attention row must be normalized against the whole key axis and
        # written out, so keep the full key axis per step on this path.
        # TODO(synk): online-softmax key tiling for the attn-emitting path
        # (needs block-offset stores into a resident attn row, or a
        # post-normalization pass over the attn output).
        TK = L2
    elif key_tile is not None:
        TK = min(int(key_tile), L2)
        if TK < L2:
            TK = max(128, (TK // 128) * 128)   # lane-aligned interior key blocks
    else:
        TK = L2
        if L2 > 1024 and _step_bytes(min(L1, 256), L2, L2, D, in_it, out_it,
                                     attn_it, emit_attn, 1) > budget:
            TK = 512                           # bound VMEM independently of L2
    n_kt = pl.cdiv(L2, TK)

    # ---- query tile: biggest MXU/sublane-aligned tile that fits the budget ---- #
    if query_tile is not None:
        TQ = _align_query_tile(min(int(query_tile), L1), L1)
    else:
        cands = [c for c in (1024, 768, 512, 384, 256, 128, 64, 32, 16, 8)
                 if c < L1]
        if L1 <= 1024:
            cands = [L1] + cands
        TQ = cands[-1] if cands else L1
        for c in cands:
            if _step_bytes(c, TK, L2, D, in_it, out_it, attn_it,
                           emit_attn, n_kt) <= budget:
                TQ = c
                break
    return TQ, TK


# --------------------------------------------------------------------------- #
# Public wrapper
# --------------------------------------------------------------------------- #
def dot_product_attention(q, k, v, rep_mask=None, *, return_attn=True,
                          attn_dtype=None, query_tile=None, key_tile=None):
    """q:(B,L1,D) k:(B,L2,D) v:(B,L2,D) rep_mask:(B,L2) ->
       (out:(B,L1,D), attn:(B,L1,L2))  or just out if return_attn=False."""
    B, L1, D = q.shape
    _, L2, _ = k.shape

    # Fold the mask once in the wrapper (no per-grid-step compares in-kernel).
    if rep_mask is None:
        keep = jnp.ones((B, 1, L2), dtype=jnp.float32)
    else:
        keep = (rep_mask > 0).astype(jnp.float32).reshape(B, 1, L2)

    out_dtype = q.dtype
    if attn_dtype is None:
        attn_dtype = q.dtype            # matches the PyTorch module's attn dtype
    in_it = jnp.dtype(q.dtype).itemsize
    out_it = jnp.dtype(out_dtype).itemsize
    attn_it = jnp.dtype(attn_dtype).itemsize

    vmem_cap = _vmem_capacity_bytes()
    budget = int(0.45 * vmem_cap)       # ~56 MiB on v5e/v6e, ~28 MiB on v7x

    emit_attn = bool(return_attn)
    TQ, TK = _pick_tiles(L1, L2, D, in_it, out_it, attn_it, emit_attn, budget,
                         query_tile, key_tile)
    n_qt = pl.cdiv(L1, TQ)
    n_kt = pl.cdiv(L2, TK)
    guard_key_edge = (L2 % TK) != 0

    # Explicit scoped-VMEM limit: estimate + 20% headroom, floor 32 MiB,
    # never above ~90% of physical VMEM (64 MiB on v7x, 128 MiB on v5e/v6e).
    est = _step_bytes(TQ, TK, L2, D, in_it, out_it, attn_it, emit_attn, n_kt)
    vmem_limit = int(est * 1.2) + 4 * _MIB
    vmem_limit = max(vmem_limit, 32 * _MIB)
    vmem_limit = min(vmem_limit, int(0.90 * vmem_cap))

    grid = (B, n_qt, n_kt)
    # Bias megacore sharding onto the batch axis when B >= 2 so K/V blocks are
    # not re-fetched per core across the query-tile axis.
    dim_sem = ("parallel", "parallel" if B < 2 else "arbitrary", "arbitrary")

    kernel = _make_kernel(n_kt=n_kt, TK=TK, L2=L2, emit_attn=emit_attn,
                          guard_key_edge=guard_key_edge)

    in_specs = [
        pl.BlockSpec((None, TQ, D), lambda b, i, kk: (b, i, 0)),    # q
        pl.BlockSpec((None, TK, D), lambda b, i, kk: (b, kk, 0)),   # k
        pl.BlockSpec((None, TK, D), lambda b, i, kk: (b, kk, 0)),   # v
        pl.BlockSpec((None, 1, TK), lambda b, i, kk: (b, 0, kk)),   # keep mask
    ]
    # TODO(synk): single-buffer K/V/mask (pipeline_mode=pl.Buffered(1)) once
    # buffer_count=1 is confirmed supported by the installed Pallas; their
    # block index only changes with b/kk, so double-buffering wastes VMEM.
    # TODO(synk): if D < 128 and the caller has multiple heads, fold heads into
    # D in the wrapper so the (TQ, D) out store is lane-dense (unmasked vst).

    out_block = pl.BlockSpec((None, TQ, D), lambda b, i, kk: (b, i, 0))
    if emit_attn:
        out_shape = (jax.ShapeDtypeStruct((B, L1, D), out_dtype),
                     jax.ShapeDtypeStruct((B, L1, L2), attn_dtype))
        out_specs = (out_block,
                     pl.BlockSpec((None, TQ, L2), lambda b, i, kk: (b, i, 0)))
    else:
        out_shape = jax.ShapeDtypeStruct((B, L1, D), out_dtype)
        out_specs = out_block

    scratch_shapes = []
    if n_kt > 1:
        scratch_shapes = [pltpu.VMEM((TQ, D), jnp.float32),   # out accumulator
                          pltpu.VMEM((TQ, 1), jnp.float32),   # running max
                          pltpu.VMEM((TQ, 1), jnp.float32)]   # running sum

    cost = pl.CostEstimate(
        flops=4 * B * L1 * L2 * D,                 # q@k^T and attn@v
        transcendentals=B * L1 * L2,               # exp
        bytes_accessed=(B * (L1 + 2 * L2) * D * in_it      # q, k, v
                        + B * L1 * D * out_it              # out
                        + (B * L1 * L2 * attn_it if emit_attn else 0)
                        + B * L2 * 4),                     # keep
    )

    return pl.pallas_call(
        kernel,
        out_shape=out_shape,
        grid=grid,
        in_specs=in_specs,
        out_specs=out_specs,
        scratch_shapes=scratch_shapes,
        compiler_params=pltpu.CompilerParams(
            dimension_semantics=dim_sem,
            vmem_limit_bytes=vmem_limit),
        cost_estimate=cost,
    )(q, k, v, keep)


# --------------------------------------------------------------------------- #
# Pure-JAX reference + tests
# --------------------------------------------------------------------------- #
def _reference(q, k, v, rep_mask):
    hp = jax.lax.Precision.HIGHEST
    scores = jnp.einsum("bld,bmd->blm", q, k, precision=hp).astype(jnp.float32)
    mask = (rep_mask > 0).astype(jnp.float32)[:, None, :]
    masked = jnp.where(mask > 0, scores, -1e30)
    masked = masked - jnp.max(masked, axis=-1, keepdims=True)
    e = jnp.exp(masked) * mask
    attn = e / (jnp.sum(e, axis=-1, keepdims=True) + 1e-13)
    out = jnp.einsum("blm,bmd->bld", attn, v.astype(jnp.float32), precision=hp)
    return out.astype(q.dtype), attn


if __name__ == "__main__":
    # ---- Test 1: module-shaped small case, returns (out, attn) ---- #
    B, L1, L2, D = 2, 8, 8, 32
    kq, kk_, kv = jax.random.split(jax.random.PRNGKey(0), 3)
    q = jax.random.normal(kq, (B, L1, D), dtype=jnp.float32)
    k = jax.random.normal(kk_, (B, L2, D), dtype=jnp.float32)
    v = jax.random.normal(kv, (B, L2, D), dtype=jnp.float32)
    # deterministic variable-length mask: batch 0 keeps all 8 keys, batch 1 keeps 5
    lengths = jnp.array([8, 5], dtype=jnp.int32)
    rep_mask = (jnp.arange(L2)[None, :] < lengths[:, None]).astype(jnp.float32)

    out, attn = dot_product_attention(q, k, v, rep_mask)
    jax.block_until_ready((out, attn))

    ref_out, ref_attn = _reference(q, k, v, rep_mask)
    assert jnp.allclose(out, ref_out, atol=1e-5, rtol=1e-5), \
        float(jnp.max(jnp.abs(out - ref_out)))
    assert jnp.allclose(attn, ref_attn.astype(attn.dtype), atol=1e-5, rtol=1e-5), \
        float(jnp.max(jnp.abs(attn - ref_attn.astype(attn.dtype))))

    # ---- Test 2: key-tiled online-softmax path (out only, forced small tiles) ---- #
    B2, L1b, L2b, D2 = 2, 128, 384, 64
    kq2, kk2, kv2 = jax.random.split(jax.random.PRNGKey(1), 3)
    q2 = jax.random.normal(kq2, (B2, L1b, D2), dtype=jnp.float32)
    k2 = jax.random.normal(kk2, (B2, L2b, D2), dtype=jnp.float32)
    v2 = jax.random.normal(kv2, (B2, L2b, D2), dtype=jnp.float32)
    lengths2 = jnp.array([384, 250], dtype=jnp.int32)
    rep_mask2 = (jnp.arange(L2b)[None, :] < lengths2[:, None]).astype(jnp.float32)

    out2 = dot_product_attention(q2, k2, v2, rep_mask2, return_attn=False,
                                 query_tile=64, key_tile=128)
    jax.block_until_ready(out2)
    ref_out2, _ = _reference(q2, k2, v2, rep_mask2)
    assert jnp.allclose(out2, ref_out2, atol=2e-3, rtol=2e-3), \
        float(jnp.max(jnp.abs(out2 - ref_out2)))

    print("KERNEL_OK")
</pallas_src>

<mosaic_0001>
module attributes {stable_mosaic.version = 11 : i64} {
  func.func @kernel(%arg0: i32, %arg1: i32, %arg2: i32, %arg3: memref<1x8x32xf32, #tpu.memory_space<vmem>>, %arg4: memref<1x8x32xf32, #tpu.memory_space<vmem>>, %arg5: memref<1x8x32xf32, #tpu.memory_space<vmem>>, %arg6: memref<1x1x8xf32, #tpu.memory_space<vmem>>, %arg7: memref<1x8x32xf32, #tpu.memory_space<vmem>>, %arg8: memref<1x8x8xf32, #tpu.memory_space<vmem>>) attributes {dimension_semantics = [#tpu.dimension_semantics<parallel>, #tpu.dimension_semantics<arbitrary>, #tpu.dimension_semantics<arbitrary>], iteration_bounds = array<i64: 2, 1, 1>, scalar_prefetch = 0 : i64, scratch_operands = 0 : i64, tpu.core_type = #tpu.core_type<tc>, window_params = [{transform_indices = @transform_0, window_bounds = array<i64: 1, 8, 32>}, {transform_indices = @transform_1, window_bounds = array<i64: 1, 8, 32>}, {transform_indices = @transform_2, window_bounds = array<i64: 1, 8, 32>}, {transform_indices = @transform_3, window_bounds = array<i64: 1, 1, 8>}, {transform_indices = @transform_4, window_bounds = array<i64: 1, 8, 32>}, {transform_indices = @transform_5, window_bounds = array<i64: 1, 8, 8>}]} {
    %c0 = arith.constant 0 : index
    %c0_0 = arith.constant 0 : index
    %c0_1 = arith.constant 0 : index
    %0 = vector.load %arg3[%c0, %c0_0, %c0_1] : memref<1x8x32xf32, #tpu.memory_space<vmem>>, vector<1x8x32xf32>
    %1 = vector.shape_cast %0 : vector<1x8x32xf32> to vector<8x32xf32>
    %c0_2 = arith.constant 0 : index
    %c0_3 = arith.constant 0 : index
    %c0_4 = arith.constant 0 : index
    %2 = vector.load %arg4[%c0_2, %c0_3, %c0_4] : memref<1x8x32xf32, #tpu.memory_space<vmem>>, vector<1x8x32xf32>
    %3 = vector.shape_cast %2 : vector<1x8x32xf32> to vector<8x32xf32>
    %c0_5 = arith.constant 0 : index
    %c0_6 = arith.constant 0 : index
    %c0_7 = arith.constant 0 : index
    %4 = vector.load %arg5[%c0_5, %c0_6, %c0_7] : memref<1x8x32xf32, #tpu.memory_space<vmem>>, vector<1x8x32xf32>
    %5 = vector.shape_cast %4 : vector<1x8x32xf32> to vector<8x32xf32>
    %c0_8 = arith.constant 0 : index
    %c0_9 = arith.constant 0 : index
    %c0_10 = arith.constant 0 : index
    %6 = vector.load %arg6[%c0_8, %c0_9, %c0_10] : memref<1x1x8xf32, #tpu.memory_space<vmem>>, vector<1x1x8xf32>
    %7 = vector.shape_cast %6 : vector<1x1x8xf32> to vector<1x8xf32>
    %cst = arith.constant dense<0.000000e+00> : vector<8x8xf32>
    %8 = tpu.matmul %1, %3, %cst {dimension_numbers = #tpu.dot_dimension_numbers<[1], [1], [0], [0], [0, 0, 1, 0], [], []>} : vector<8x32xf32>, vector<8x32xf32>, vector<8x8xf32> -> vector<8x8xf32>
    %cst_11 = arith.constant 1.000000e+00 : f32
    %9 = vector.broadcast %cst_11 : f32 to vector<1x8xf32>
    %10 = arith.subf %7, %9 : vector<1x8xf32>
    %cst_12 = arith.constant 1.000000e+30 : f32
    %11 = vector.broadcast %cst_12 : f32 to vector<1x8xf32>
    %12 = arith.mulf %10, %11 : vector<1x8xf32>
    %13 = vector.broadcast %12 : vector<1x8xf32> to vector<8x8xf32>
    %14 = arith.addf %8, %13 : vector<8x8xf32>
    %cst_13 = arith.constant dense<0xFF800000> : vector<8xf32>
    %15 = vector.multi_reduction <maximumf>, %14, %cst_13 [1] : vector<8x8xf32> to vector<8xf32>
    %16 = vector.shape_cast %15 : vector<8xf32> to vector<8x1xf32>
    %17 = vector.broadcast %16 : vector<8x1xf32> to vector<8x8xf32>
    %18 = arith.subf %14, %17 : vector<8x8xf32>
    %19 = math.exp %18 : vector<8x8xf32>
    %20 = vector.broadcast %7 : vector<1x8xf32> to vector<8x8xf32>
    %21 = arith.mulf %19, %20 : vector<8x8xf32>
    %cst_14 = arith.constant dense<0.000000e+00> : vector<8xf32>
    %22 = vector.multi_reduction <add>, %21, %cst_14 [1] : vector<8x8xf32> to vector<8xf32>
    %23 = vector.shape_cast %22 : vector<8xf32> to vector<8x1xf32>
    %cst_15 = arith.constant 9.99999982E-14 : f32
    %24 = vector.broadcast %cst_15 : f32 to vector<8x1xf32>
    %25 = arith.addf %23, %24 : vector<8x1xf32>
    %26 = tpu.reciprocal %25 : vector<8x1xf32> -> vector<8x1xf32>
    %27 = vector.broadcast %26 : vector<8x1xf32> to vector<8x8xf32>
    %28 = arith.mulf %21, %27 : vector<8x8xf32>
    %cst_16 = arith.constant dense<0.000000e+00> : vector<8x32xf32>
    %29 = tpu.matmul %28, %5, %cst_16 {dimension_numbers = #tpu.dot_dimension_numbers<[1], [0], [0], [1], [0, 0, 1, 1], [], []>} : vector<8x8xf32>, vector<8x32xf32>, vector<8x32xf32> -> vector<8x32xf32>
    %c0_17 = arith.constant 0 : index
    %c0_18 = arith.constant 0 : index
    %c0_19 = arith.constant 0 : index
    %30 = vector.load %arg7[%c0_17, %c0_18, %c0_19] : memref<1x8x32xf32, #tpu.memory_space<vmem>>, vector<1x8x32xf32>
    %31 = vector.shape_cast %30 : vector<1x8x32xf32> to vector<8x32xf32>
    %32 = vector.shape_cast %29 : vector<8x32xf32> to vector<1x8x32xf32>
    tpu.vector_store %arg7[%c0_17, %c0_18, %c0_19], %32 {strides = array<i32>} : memref<1x8x32xf32, #tpu.memory_space<vmem>>, vector<1x8x32xf32>,
    %c0_20 = arith.constant 0 : index
    %c0_21 = arith.constant 0 : index
    %c0_22 = arith.constant 0 : index
    %33 = vector.load %arg8[%c0_20, %c0_21, %c0_22] : memref<1x8x8xf32, #tpu.memory_space<vmem>>, vector<1x8x8xf32>
    %34 = vector.shape_cast %33 : vector<1x8x8xf32> to vector<8x8xf32>
    %35 = vector.shape_cast %28 : vector<8x8xf32> to vector<1x8x8xf32>
    tpu.vector_store %arg8[%c0_20, %c0_21, %c0_22], %35 {strides = array<i32>} : memref<1x8x8xf32, #tpu.memory_space<vmem>>, vector<1x8x8xf32>,
    return
  }
  func.func @transform_0(%arg0: i32, %arg1: i32, %arg2: i32) -> (i32, i32, i32) {
    %c0_i32 = arith.constant 0 : i32
    %c0_i32_0 = arith.constant 0 : i32
    return %arg0, %arg1, %c0_i32 : i32, i32, i32
  }
  func.func @transform_1(%arg0: i32, %arg1: i32, %arg2: i32) -> (i32, i32, i32) {
    %c0_i32 = arith.constant 0 : i32
    %c0_i32_0 = arith.constant 0 : i32
    return %arg0, %arg2, %c0_i32 : i32, i32, i32
  }
  func.func @transform_2(%arg0: i32, %arg1: i32, %arg2: i32) -> (i32, i32, i32) {
    %c0_i32 = arith.constant 0 : i32
    %c0_i32_0 = arith.constant 0 : i32
    return %arg0, %arg2, %c0_i32 : i32, i32, i32
  }
  func.func @transform_3(%arg0: i32, %arg1: i32, %arg2: i32) -> (i32, i32, i32) {
    %c0_i32 = arith.constant 0 : i32
    %c0_i32_0 = arith.constant 0 : i32
    return %arg0, %c0_i32, %arg2 : i32, i32, i32
  }
  func.func @transform_4(%arg0: i32, %arg1: i32, %arg2: i32) -> (i32, i32, i32) {
    %c0_i32 = arith.constant 0 : i32
    %c0_i32_0 = arith.constant 0 : i32
    return %arg0, %arg1, %c0_i32 : i32, i32, i32
  }
  func.func @transform_5(%arg0: i32, %arg1: i32, %arg2: i32) -> (i32, i32, i32) {
    %c0_i32 = arith.constant 0 : i32
    %c0_i32_0 = arith.constant 0 : i32
    return %arg0, %arg1, %c0_i32 : i32, i32, i32
  }
}

</mosaic_0001>

<bundles_post_ra>
// kernel: tpu_custom_call.1
= control target key start
LH: loop header
LB: loop body
LE: loop exit
PB: predicated region body
PF: predicated region fallthrough
CT: control target
= control target key end

     0   :  { %s1444_s0 = inlined_call_operand.hbm [shape: f32[2,8,32], index: 0, kind: input, shape index: {}]   ;;  %s1445_s1 = inlined_call_operand.hbm [shape: f32[2,8,32], index: 1, kind: input, shape index: {}]   ;;  %s1446_s2 = inlined_call_operand.hbm [shape: f32[2,8,32], index: 2, kind: input, shape index: {}]   ;;  %s1447_s3 = inlined_call_operand.vmem [shape: f32[2,1,8], index: 3, kind: input, shape index: {}]   ;;  %s1448_s4 = inlined_call_operand.hbm [shape: f32[2,8,32], index: 4, kind: output, shape index: {0}]   ;;  %s1449_s5 = inlined_call_operand.hbm [shape: f32[2,8,8], index: 5, kind: output, shape index: {1}]  }
   0x1   :  { %1459 = sst [smem:[#allocation20_spill]] %s1445_s1 }
   0x2   :  { %11 = vsyncpa [#allocation3], 0 }
   0x3   :  { %13 = vsyncpa [#allocation3 + $0x1], 0 }
   0x4   :  { %14 = vsyncpa [#allocation6], 0 }
   0x5   :  { %16 = vsyncpa [#allocation6 + $0x1], 0 }
   0x6   :  { %17 = vsyncpa [#allocation4], 0 }
   0x7   :  { %19 = vsyncpa [#allocation4 + $0x1], 0 }
   0x8   :  { %20 = vsyncpa [#allocation10], 0 }
   0x9   :  { %22 = vsyncpa [#allocation10 + $0x1], 0  ;;  %s1140_s18 = smov 0   ;;  %s1142_s19 = smov 0  }
   0xa   :  { %s1144_s20 = smov 0   ;;  %s1146_s21 = smov 0  }
   0xb   :  { %s1148_s22 = smov 0   ;;  %s1150_s23 = smov 0  }
   0xc LB: > { %1460 = sst [smem:[#allocation15_spill]] %s1097_s22  ;;  %s1171_s24 = sadd.s32 4294967295, %s1101_s23   ;;  %s1101_s23 = sphi %s1150_s23, %s28_s23   ;;  %s1097_s22 = sphi %s1148_s22, %s1486_s22   ;;  %s1093_s21 = sphi %s1146_s21, %s1485_s21   ;;  %s1089_s20 = sphi %s1144_s20, %s1489_s20   ;;  %s1085_s19 = sphi %s1142_s19, %s1488_s19   ;;  %s1081_s18 = sphi %s1140_s18, %s1487_s18  }
   0xd   : > { %1461 = sst [smem:[#allocation16_spill]] %s1101_s23  ;;  %s771_s25 = sadd.s32 4294967294, %s1101_s23  }
   0xe   : > { %s47_s26 = sadd.s32 1, %s1097_s22  ;;  %s56_s27 = sadd.s32 1, %s1089_s20 }
   0xf   : > { %p49_p0 = scmp.ge.s32.totalorder %s47_s26, 2  ;;  %p63_p1 = scmp.ne.s32.totalorder %s1089_s20, %s1085_s19 }
  0x10   : > { %p64_p2 = scmp.eq.s32.totalorder %s1101_s23, 0  ;;  %p69_p3 = scmp.ne.s32.totalorder %s1085_s19, %s1081_s18 }
  0x11   : > { %s1491_s26 = smov (%p49_p0, %s47_s26), 0  ;;  %p70_p5 = scmp.eq.s32.totalorder %s1171_s24, 0 }
  0x12   : > { %1462 = sst [smem:[#allocation17_spill]] %s1491_s26  ;;  %p1183_p4 = por %p64_p2, %p63_p1 }
  0x13   : > { %s51_s29 = ssub.s32 %s1097_s22, %s1491_s26  ;;  %p179_p6 = scmp.eq.s32.totalorder %s1171_s24, 1 }
  0x14   : > { %p54_p7 = scmp.eq.s32.totalorder %s51_s29, 0  ;;  %p1191_p8 = por %p70_p5, %p69_p3 }
  0x15   : > { %p1195_p9 = por %p179_p6, %p63_p1  ;;  %p185_p10 = scmp.eq.s32.totalorder %s771_s25, 1 }
  0x16   : > { %s1464_s30 = scalar_select %p1191_p8, 1, 0 }
  0x17   : > { %s1465_s6 = scalar_select %p1195_p9, 1, 0 }
  0x18   : > { %s1200_s7 = scalar_select %p54_p7, %s1089_s20, %s56_s27  }
  0x19   : > { %p1202_p11 = por %p185_p10, %p69_p3  ;;  %p837_p13 = scmp.lt.s32.totalorder %s1101_s23, 2 }
  0x1a   : > { %1466 = sst [smem:[#allocation18_spill]] %s1200_s7  ;;  %s1450_s9 = sand.u32 1, %s1089_s20  }
  0x1b   : > { %s1467_s8 = scalar_select %p1202_p11, 1, 0 }
  0x1c   : > { %s1211_s10 = sshll.u32 %s1450_s9, 3  ;;  %s1214_s11 = sshll.u32 %s1097_s22, 7 }
  0x1d   : > { %1468 = sst [smem:[#allocation19_spill]] %s1467_s8  ;;  %p1218_p0 = pnand %p837_p13, %p1183_p4 }
  0x1e   : > { %s252_s13 = sand.u32 1, %s1101_s23   ;;  %s1470_s1 = sld [smem:[#allocation20_spill]] }
  0x1f   : > { %s1469_s12 = scalar_select %p1218_p0, 1, 0 }
  0x20   : > { %s256_s17 = scalar_lea.vmem [#allocation5], %s1211_s10  ;;  %s1234_s27 = scalar_lea.sflag [#allocation6], %s252_s13 }
  0x21   : > { %s264_s25 = sshll.u32 %s256_s17, 4  ;;  %p1240_p4 = pneg %p1218_p0  ;;  %s1231_s25 = int_to_ptr.vmem [resolvable:$true] %s264_s25 }
  0x24   : > { %s1227_s16 = scalar_lea.hbm %s1470_s1, %s1214_s11  ;;  %s898_s17 = scalar_lea.hbm %s1470_s1, 256 }
  0x25   : > { %s893_s28 = scalar_lea.hbm %s1227_s16, 128  ;;  %p899_p7 = scmp.lt.u32.totalorder %s1227_s16, %s1470_s1 }
  0x26   : > { %p894_p3 = scmp.ne.s32.totalorder %s1227_s16, %s893_s28  ;;  %p900_p10 = scmp.lt.u32.totalorder %s898_s17, %s893_s28 }
  0x27   : > { %p902_p12 = scmp.lt.u32.totalorder %s893_s28, %s1227_s16 }
  0x28   : > { %p896_p5 = pnand %p1240_p4, %p894_p3  ;;  %p901_p13 = por %p900_p10, %p899_p7 }
  0x2a   : > { %p897_p6 = pneg %p896_p5  ;;  %p903_p1 = por %p902_p12, %p901_p13 }
  0x2c   : > { %p904_p2 = pnand %p903_p1, %p897_p6 }
  0x2e   : > { %907 = shalt.err (!%p904_p2)
}
  0x2f   : > { %s908_s13 = scalar_lea.vmem %s1231_s25, 128  ;;  %s1103_s14 = smov [#allocation5]  }
  0x30   : > { %p909_p3 = scmp.ne.s32.totalorder %s1231_s25, %s908_s13  ;;  %s913_s15 = sshll.u32 %s1103_s14, 4  ;;  %s914_s15 = int_to_ptr.vmem [resolvable:$false] %s913_s15 }
  0x31   : > { %s915_s26 = scalar_lea.vmem %s914_s15, 256  ;;  %p916_p9 = scmp.lt.s32.totalorder %s1231_s25, %s914_s15 }
  0x32   : > { %p911_p5 = pnand %p909_p3, %p1240_p4  ;;  %p917_p8 = scmp.lt.s32.totalorder %s915_s26, %s908_s13 }
  0x34   : > { %p912_p11 = pneg %p911_p5  ;;  %p918_p7 = por %p917_p8, %p916_p9 }
  0x36   : > { %p919_p10 = pnand %p918_p7, %p912_p11 }
  0x38   : > { %922 = shalt.err (!%p919_p10)
}
  0x39   : > { %826 = dma.hbm_to_vmem [thread:$0]  (!%p1218_p0), %s1227_s16, 128, %s1231_s25, %s1234_s27  }
  0x3a   : > { %p1472_p12 = scmp.lt.s32.totalorder %s1101_s23, 3  ;;  %p1473_p1 = scmp.ge.s32.totalorder %s1101_s23, 1 }
  0x3b   : > { %s1276_s13 = scalar_lea.hbm %s1444_s0, %s1214_s11  ;;  %s237_s14 = scalar_lea.vmem [#allocation2], %s1211_s10 }
  0x3c   : > { %p1268_p2 = pnand %p1473_p1, %p1472_p12  ;;  %s245_s15 = sshll.u32 %s237_s14, 4  ;;  %s1279_s15 = int_to_ptr.vmem [resolvable:$true] %s245_s15 }
  0x3d   : > { %s1285_s26 = scalar_lea.hbm %s1446_s2, %s1214_s11  ;;  %s1475_s1 = sand.u32 1, %s1089_s20  }
  0x3e   : > { %s1474_s9 = scalar_select %p1268_p2, 1, 0 }
  0x3f   : > { %s234_s22 = scalar_lea.sflag [#allocation3], %s1475_s1  ;;  %s923_s7 = scalar_lea.hbm %s1276_s13, 128 }
  0x40   : > { %p924_p8 = scmp.ne.s32.totalorder %s1276_s13, %s923_s7  ;;  %s928_s23 = scalar_lea.hbm %s1444_s0, 256 }
  0x41   : > { %p929_p6 = scmp.lt.u32.totalorder %s1276_s13, %s1444_s0  ;;  %p930_p13 = scmp.lt.u32.totalorder %s928_s23, %s923_s7 }
  0x42   : > { %p926_p9 = pnand %p924_p8, %p1240_p4  ;;  %p932_p5 = scmp.lt.u32.totalorder %s923_s7, %s1276_s13 }
  0x43   : > { %p931_p3 = por %p930_p13, %p929_p6 }
  0x44   : > { %p927_p11 = pneg %p926_p9 }
  0x45   : > { %p933_p7 = por %p932_p5, %p931_p3 }
  0x47   : > { %p934_p10 = pnand %p933_p7, %p927_p11 }
  0x49   : > { %937 = shalt.err (!%p934_p10)
}
  0x4a   : > { %s938_s1 = scalar_lea.vmem %s1279_s15, 128  ;;  %s1104_s11 = smov [#allocation2]  }
  0x4b   : > { %p939_p12 = scmp.ne.s32.totalorder %s1279_s15, %s938_s1  ;;  %s943_s16 = sshll.u32 %s1104_s11, 4  ;;  %s944_s16 = int_to_ptr.vmem [resolvable:$false] %s943_s16 }
  0x4c   : > { %s945_s8 = scalar_lea.vmem %s944_s16, 256  ;;  %p946_p9 = scmp.lt.s32.totalorder %s1279_s15, %s944_s16 }
  0x4d   : > { %p941_p1 = pnand %p939_p12, %p1240_p4  ;;  %p947_p2 = scmp.lt.s32.totalorder %s945_s8, %s938_s1 }
  0x4f   : > { %p942_p8 = pneg %p941_p1  ;;  %p948_p6 = por %p947_p2, %p946_p9 }
  0x51   : > { %p949_p13 = pnand %p948_p6, %p942_p8 }
  0x53   : > { %952 = shalt.err (!%p949_p13)
}
  0x54   : > { %823 = dma.hbm_to_vmem [thread:$0]  (!%p1218_p0), %s1276_s13, 128, %s1279_s15, %s234_s22  }
  0x55   : > { %s275_s23 = scalar_lea.vmem [#allocation7], %s1211_s10  ;;  %s953_s25 = scalar_lea.hbm %s1285_s26, 128 }
  0x56   : > { %s283_s7 = sshll.u32 %s275_s23, 4  ;;  %p954_p11 = scmp.ne.s32.totalorder %s1285_s26, %s953_s25  ;;  %s284_s7 = int_to_ptr.vmem [resolvable:$true] %s283_s7 }
  0x57   : > { %s958_s14 = scalar_lea.hbm %s1446_s2, 256  ;;  %p959_p5 = scmp.lt.u32.totalorder %s1285_s26, %s1446_s2 }
  0x58   : > { %p956_p2 = pnand %p954_p11, %p1240_p4  ;;  %p960_p7 = scmp.lt.u32.totalorder %s958_s14, %s953_s25 }
  0x59   : > { %p962_p12 = scmp.lt.u32.totalorder %s953_s25, %s1285_s26 }
  0x5a   : > { %p957_p3 = pneg %p956_p2  ;;  %p961_p10 = por %p960_p7, %p959_p5 }
  0x5c   : > { %p963_p1 = por %p962_p12, %p961_p10 }
  0x5e   : > { %p964_p8 = pnand %p963_p1, %p957_p3 }
  0x60   : > { %967 = shalt.err (!%p964_p8)
}
  0x61   : > { %s968_s22 = scalar_lea.vmem %s284_s7, 128  ;;  %s1105_s10 = smov [#allocation7]  }
  0x62   : > { %p969_p9 = scmp.ne.s32.totalorder %s284_s7, %s968_s22  ;;  %s973_s13 = sshll.u32 %s1105_s10, 4  ;;  %s974_s13 = int_to_ptr.vmem [resolvable:$false] %s973_s13 }
  0x63   : > { %s975_s15 = scalar_lea.vmem %s974_s13, 256  ;;  %p976_p11 = scmp.lt.s32.totalorder %s284_s7, %s974_s13 }
  0x64   : > { %p971_p6 = pnand %p969_p9, %p1240_p4  ;;  %p977_p2 = scmp.lt.s32.totalorder %s975_s15, %s968_s22 }
  0x66   : > { %p972_p13 = pneg %p971_p6  ;;  %p978_p0 = por %p977_p2, %p976_p11 }
  0x68   : > { %p979_p5 = pnand %p978_p0, %p972_p13 }
  0x6a   : > { %982 = shalt.err (!%p979_p5)
}
  0x6b   : > { %p1476_p7 = scmp.ne.s32.totalorder %s1469_s12, 0  ;;  %p1477_p3 = scmp.ne.s32.totalorder %s1474_s9, 0 }
  0x6c   : > { %s1332_s29 = sand.u32 (!%p1477_p3), 1, %s1085_s19   ;;  %p1478_p0 = scmp.ne.s32.totalorder (!%p1477_p3), %s1464_s30, 0 }
  0x6d   : > { %829 = dma.hbm_to_vmem [thread:$0]  (!%p1476_p7), %s1285_s26, 128, %s284_s7, %s1234_s27  }
  0x6e   : > { %301 = sbr.rel (%p1477_p3) target bundleno = 885 (0x375), region = 36  ;;  %s1335_s16 = sshll.u32 (!%p1477_p3), %s1332_s29, 3 }
  0x6f   : > { %s304_s8 = scalar_lea.sflag (!%p1477_p3), [#allocation3], %s1332_s29  ;;  %s307_s23 = scalar_lea.vmem (!%p1477_p3), [#allocation2], %s1335_s16 }
  0x75   : > { %1064 = dma.done.wait (%p1478_p0), %s304_s8, 128  }
  0x76   : > { %1066 = vsyncadd (%p1478_p0), %s304_s8, 4294967168  ;;  %s312_s12 = sand.u32 1, %s1171_s24   ;;  %s316_s9 = scalar_lea.vmem [#allocation5], %s1335_s16 }
  0x77   : > { %s313_s27 = scalar_lea.sflag [#allocation6], %s312_s12 }
  0x78   : > { %1068 = dma.done.wait (%p1478_p0), %s313_s27, 256  }
  0x79   : > { %1070 = vsyncadd (%p1478_p0), %s313_s27, 4294967040  ;;  %v1106_v0 = vmov 0.0   ;;  %vm1107_vm0 = vmmov 0   ;;  %vm391_vm1 = vcmask 261120   ;;  %v380_v1 = vld [vmem:[%s316_s9] sm:$0xff]  ;;  %v379_v2 = vld [vmem:[%s307_s23] sm:$0xff]  ;;  %v386_v3 = vlaneseq }
  0x7a   : > { %800 = vmatprep.subr.mxu0 %v1106_v0  ;;  %802 = vmatprep.mubr.msk.f32.mxu0 %vm1107_vm0, %v1106_v0  ;;  %p373_p4 = scmp.lt.s32.totalorder %s1093_s21, 1  ;;  %vm468_vm2 = vcmask 64512   ;;  %s325_s25 = scalar_lea.vmem [#allocation7], %s1335_s16 }
  0x7b   : > { %805 = vmatprep.subr.mxu1 %v1106_v0  ;;  %807 = vmatprep.mubr.msk.f32.mxu1 %vm1107_vm0, %v1106_v0  ;;  %v387_v6 = vshrl.u32 %v386_v3, 7  ;;  %v381_v21 = vld [vmem:[%s325_s25] sm:$0xff]  ;;  %s372_s28 = scalar_lea.vmem [#allocation9], %s1335_s16  ;;  %s792_s17 = sshll.u32 %s1093_s21, 7 }
  0x7c   : > { %801 = vmatpush3.xpose.msk.msra.mxu0 %vm391_vm1, %v380_v1  ;;  %s374_s24 = scalar_select %p373_p4, %s1093_s21, 1  ;;  %806 = vmatpush3.msra.mxu1 %v381_v21 }
  0x7d   : > { %v388_v8 = vsub.s32 0, %v387_v6  ;;  %s1368_s11 = scalar_lea.hbm %s1449_s5, %s792_s17  ;;  %s597_s22 = sshll.u32 %s372_s28, 4  ;;  %s598_s22 = int_to_ptr.vmem [resolvable:$true] %s597_s22 }
  0x7e   : > { %s378_s7 = scalar_lea.vmem %s1447_s3, %s374_s24  ;;  %s569_s10 = scalar_lea.sflag [#allocation10], %s1332_s29 }
  0x7f   : > { %803 = vmatmul.mubr.msk.f32.vlgmr.msra.gmra.mrb[0].mxu0 %vm391_vm1, %v379_v2  ;;  %v382_v4 = vld [vmem:[%s378_s7] sm:$0x1]  ;;  %s983_s13 = scalar_lea.vmem %s598_s22, 128  ;;  %p1479_p12 = scmp.ne.s32.totalorder %s1465_s6, 0 }
  0x80   : > { %v786_v5 = vadd.f32 -1.0, %v382_v4  ;;  %v479_v17 = vrot.slane %v382_v4, %v388_v8  ;;  %p984_p10 = scmp.ne.s32.totalorder %s598_s22, %s983_s13  ;;  %s1108_s15 = smov [#allocation9]  }
  0x81   : > { %s987_s8 = sshll.u32 %s1108_s15, 4  ;;  %s988_s8 = int_to_ptr.vmem [resolvable:$false] %s987_s8 }
  0x82   : > { %v384_v7 = vmul.f32 1e+30, %v786_v5  ;;  %p985_p1 = pnand %p984_p10, %p1479_p12  ;;  %s989_s23 = scalar_lea.vmem %s988_s8, 256 }
  0x83   : > { %p990_p9 = scmp.lt.s32.totalorder %s598_s22, %s988_s8  ;;  %p991_p6 = scmp.lt.s32.totalorder %s989_s23, %s983_s13 }
  0x84   : > { %v389_v9 = vrot.slane %v384_v7, %v388_v8  ;;  %p986_p8 = pneg %p985_p1 }
  0x85   : > { %p992_p13 = por %p991_p6, %p990_p9 }
  0x87   : > { %p993_p11 = pnand %p992_p13, %p986_p8 }
 0x152   : > { %v464_v10 = vpop.f32.mrb[0].mxu0 }
 0x153   : > { %v465_v11 = vadd.f32 %v464_v10, %v389_v9  ;;  %v804_v12 = vpop.f32.mrb[1].mxu0 }
 0x155   : > { %v469_v13 = vsel %vm468_vm2, %v465_v11, -inf }
 0x156   : > { %470 = vmax.xlane.f32.xlu0 %v469_v13 }
 0x1e3   : > { %v471_v14 = vpop.xlane.xlu0 %470 }
 0x1e4   : > { %v472_v15 = vsub.f32 %v465_v11, %v471_v14 }
 0x1e6   : > { %v473_v16 = vmul.f32 1.442695, %v472_v15 }
 0x1e8   : > { %889 = vpow2.f32 %v473_v16 }
 0x1f2   : > { %v890_v18 = vpop.eup %889 }
 0x1f3   : > { %v481_v19 = vmul.f32 %v890_v18, %v479_v17 }
 0x1f5   : > { %v482_v20 = vsel %vm468_vm2, %v481_v19, 0.0 }
 0x1f6   : > { %483 = vadd.xlane.f32.xlu0 %v482_v20 }
 0x283   : > { %v484_v22 = vpop.xlane.xlu0 %483 }
 0x284   : > { %v485_v23 = vadd.f32 1e-13, %v484_v22 }
 0x286   : > { %891 = vrcp.f32 %v485_v23 }
 0x290   : > { %v892_v24 = vpop.eup %891 }
 0x291   : > { %v487_v25 = vmul.f32 %v892_v24, %v481_v19 }
 0x293   : > { %808 = vmatmul.mubr.msk.f32.vlgmr.msra.gmra.mrb[0].mxu1 %vm468_vm2, %v487_v25  ;;  %562 = vst.msk [vmem:[%s372_s28] sm:$0xff] %vm468_vm2, %v487_v25 }
 0x294   : > { %996 = shalt.err (!%p993_p11)
}
 0x295   : > { %s997_s12 = scalar_lea.hbm %s1368_s11, 128  ;;  %s1001_s24 = scalar_lea.hbm %s1449_s5, 256 }
 0x296   : > { %p998_p2 = scmp.ne.s32.totalorder %s1368_s11, %s997_s12  ;;  %p1002_p3 = scmp.lt.u32.totalorder %s1368_s11, %s1449_s5 }
 0x297   : > { %p1003_p0 = scmp.lt.u32.totalorder %s1001_s24, %s997_s12  ;;  %p1005_p10 = scmp.lt.u32.totalorder %s997_s12, %s1368_s11 }
 0x298   : > { %p999_p5 = pnand %p998_p2, %p1479_p12 }
 0x299   : > { %p1004_p4 = por %p1003_p0, %p1002_p3 }
 0x29a   : > { %p1000_p7 = pneg %p999_p5 }
 0x29b   : > { %p1006_p1 = por %p1005_p10, %p1004_p4 }
 0x29d   : > { %p1007_p8 = pnand %p1006_p1, %p1000_p7 }
 0x29f   : > { %1010 = shalt.err (!%p1007_p8)
}
 0x2a0   : > { %817 = dma.vmem_to_hbm [thread:$0]  (%p1479_p12), %s598_s22, 128, %s1368_s11, %s569_s10  }
 0x2a1   : > { %s365_s7 = scalar_lea.vmem [#allocation8], %s1335_s16  ;;  %s1394_s1 = scalar_lea.hbm %s1448_s4, %s792_s17 }
 0x2a2   : > { %s583_s25 = sshll.u32 %s365_s7, 4  ;;  %s564_s13 = scalar_lea.sflag [#allocation4], %s1332_s29  ;;  %s1396_s25 = int_to_ptr.vmem [resolvable:$true] %s583_s25 }
 0x2a3   : > { %s1011_s15 = scalar_lea.vmem %s1396_s25, 128  ;;  %s1109_s21 = smov [#allocation8]  }
 0x2a4   : > { %p1012_p9 = scmp.ne.s32.totalorder %s1396_s25, %s1011_s15  ;;  %s1015_s16 = sshll.u32 %s1109_s21, 4  ;;  %s1016_s16 = int_to_ptr.vmem [resolvable:$false] %s1015_s16 }
 0x2a5   : > { %s1017_s17 = scalar_lea.vmem %s1016_s16, 256  ;;  %p1018_p11 = scmp.lt.s32.totalorder %s1396_s25, %s1016_s16 }
 0x2a6   : > { %p1013_p6 = pnand %p1012_p9, %p1479_p12  ;;  %p1019_p2 = scmp.lt.s32.totalorder %s1017_s17, %s1011_s15 }
 0x2a8   : > { %p1014_p13 = pneg %p1013_p6  ;;  %p1020_p5 = por %p1019_p2, %p1018_p11 }
 0x2aa   : > { %p1021_p7 = pnand %p1020_p5, %p1014_p13 }
 0x366   : > { %v557_v26 = vpop.f32.mrb[0].mxu1 }
 0x367   : > { %561 = vst.msk [vmem:[%s365_s7] sm:$0xff] %vm391_vm1, %v557_v26  ;;  %v809_v27 = vpop.f32.mrb[1].mxu1 }
 0x368   : > { %1024 = shalt.err (!%p1021_p7)
}
 0x369   : > { %s1025_s29 = scalar_lea.hbm %s1394_s1, 128  ;;  %s1029_s10 = scalar_lea.hbm %s1448_s4, 256 }
 0x36a   : > { %p1026_p3 = scmp.ne.s32.totalorder %s1394_s1, %s1025_s29  ;;  %p1030_p10 = scmp.lt.u32.totalorder %s1394_s1, %s1448_s4 }
 0x36b   : > { %p1031_p1 = scmp.lt.u32.totalorder %s1029_s10, %s1025_s29  ;;  %p1033_p9 = scmp.lt.u32.totalorder %s1025_s29, %s1394_s1 }
 0x36c   : > { %p1027_p0 = pnand %p1026_p3, %p1479_p12 }
 0x36d   : > { %p1032_p8 = por %p1031_p1, %p1030_p10 }
 0x36e   : > { %p1028_p4 = pneg %p1027_p0 }
 0x36f   : > { %p1034_p6 = por %p1033_p9, %p1032_p8 }
 0x371   : > { %p1035_p13 = pnand %p1034_p6, %p1028_p4 }
 0x373   : > { %1038 = shalt.err (!%p1035_p13)
}
 0x374   : > { %816 = dma.vmem_to_hbm [thread:$0]  (%p1479_p12), %s1396_s25, 128, %s1394_s1, %s564_s13  }
 0x375 PF: > { %s1480_s12 = sld [smem:[#allocation19_spill]]  ;;  %s1481_s27 = sld [smem:[#allocation16_spill]] }
 0x376   : > { %s609_s9 = sand.u32 1, %s1081_s18  }
 0x377   : > { %s610_s24 = scalar_lea.sflag [#allocation4], %s609_s9 }
 0x37b   : > { %p1482_p11 = scmp.ne.s32.totalorder %s1480_s12, 0  ;;  %p1483_p2 = scmp.ge.s32.totalorder %s1481_s27, 2 }
 0x37d   : > { %p831_p5 = pnand %p1483_p2, %p1482_p11 }
 0x37f   : > { %1072 = dma.done.wait (!%p831_p5), %s610_s24, 128  }
 0x380   : > { %1074 = vsyncadd (!%p831_p5), %s610_s24, 4294967168  ;;  %s619_s26 = scalar_lea.sflag [#allocation10], %s609_s9 }
 0x381   : > { %1076 = dma.done.wait (!%p831_p5), %s619_s26, 128  }
 0x382   : > { %1078 = vsyncadd (!%p831_p5), %s619_s26, 4294967168  ;;  %s28_s23 = sadd.s32 1, %s1481_s27   ;;  %s1484_s6 = sld [smem:[#allocation18_spill]] }
 0x383   : > { %p25_p7 = scmp.ge.s32.totalorder %s28_s23, 4   ;;  %s1485_s21 = sld [smem:[#allocation15_spill]] }
 0x384   : > { %s1486_s22 = sld [smem:[#allocation17_spill]]  ;;  %s1487_s18 = smov %s1085_s19 }
 0x385   : > { %s1488_s19 = smov %s1089_s20  ;;  %27 = sbr.rel (!%p25_p7) target bundleno = 12 (0xc), region = 125 }
 0x388   : > { %s1489_s20 = smov %s1484_s6 }
 0x38c   :  { %624 = vsyncpa [#allocation3], 1 }
 0x38d   :  { %626 = vsyncpa [#allocation3 + $0x1], 1 }
 0x38e   :  { %627 = vsyncpa [#allocation6], 1 }
 0x38f   :  { %629 = vsyncpa [#allocation6 + $0x1], 1 }
 0x390   :  { %630 = vsyncpa [#allocation4], 1 }
 0x391   :  { %632 = vsyncpa [#allocation4 + $0x1], 1 }
 0x392   :  { %633 = vsyncpa [#allocation10], 1 }
 0x393   :  { %635 = vsyncpa [#allocation10 + $0x1], 1 }

</bundles_post_ra>
